<compile_context>
chip_gen: v7x
topology: tpu7x:2x2x1
jax: 0.10.0
libtpu: 0.0.40
codegen_flags: <defaults>
</compile_context>

<pallas_src>
import functools

import jax
import jax.numpy as jnp
from jax.experimental import pallas as pl
from jax.experimental.pallas import tpu as pltpu


def _pool_kernel(x_ref, sum_ref, max_ref, *, hw, hw_tile, mask_needed):
    # x_ref:   (rows_tile, hw_tile)   current (N*C)-rows block / HW tile
    # sum_ref: (rows_tile, 1)         running sum  (output used as accumulator)
    # max_ref: (rows_tile, 1)         running max  (output used as accumulator)
    s = pl.program_id(1)
    last = pl.num_programs(1) - 1

    @pl.when(s == 0)
    def _():
        sum_ref[...] = jnp.zeros_like(sum_ref)
        max_ref[...] = jnp.full_like(max_ref, -jnp.inf)

    x = x_ref[...].astype(jnp.float32)

    def _accumulate(x_sum, x_max):
        sum_ref[...] = sum_ref[...] + jnp.sum(x_sum, axis=-1, keepdims=True)
        max_ref[...] = jnp.maximum(max_ref[...],
                                   jnp.max(x_max, axis=-1, keepdims=True))

    if mask_needed:
        # Steady-state steps: pure streaming reduce, no per-element mask work.
        @pl.when(s != last)
        def _():
            _accumulate(x, x)

        # Only the final HW tile is partial; mask it there.
        @pl.when(s == last)
        def _():
            lane = jax.lax.broadcasted_iota(jnp.int32, x.shape, dimension=1)
            valid = (s * hw_tile + lane) < hw
            _accumulate(jnp.where(valid, x, 0.0),
                        jnp.where(valid, x, -jnp.inf))
    else:
        _accumulate(x, x)


def _mlp_kernel(sum_ref, max_ref, w1t_ref, w2t_ref, o_ref, *, inv_hw):
    # sum_ref/max_ref: (nb, C) pooled sum / max
    # w1t_ref: (C, Cr); w2t_ref: (Cr, C); o_ref: (nb, C)
    avg = sum_ref[...] * inv_hw
    mx = max_ref[...]
    w1t = w1t_ref[...]
    w2t = w2t_ref[...]
    h_a = jnp.maximum(jnp.dot(avg, w1t, preferred_element_type=jnp.float32), 0.0)
    h_m = jnp.maximum(jnp.dot(mx, w1t, preferred_element_type=jnp.float32), 0.0)
    # Second MLP layer is linear: apply it once to the sum of the hidden acts.
    logits = jnp.dot(h_a + h_m, w2t, preferred_element_type=jnp.float32)
    o_ref[...] = jax.nn.sigmoid(logits).astype(o_ref.dtype)


def _vmem_budget():
    """Generation-aware (target_block_bytes, vmem_limit_bytes)."""
    try:
        vmem_cap = pltpu.get_tpu_info().vmem_capacity_bytes
    except Exception:
        vmem_cap = 64 * 1024 * 1024            # conservative (v7x-sized)
    if vmem_cap >= 100 * 1024 * 1024:          # v5e / v6e: 128 MiB per TC
        return 8 * 1024 * 1024, 64 * 1024 * 1024
    return 4 * 1024 * 1024, 32 * 1024 * 1024   # v7x: 64 MiB per TC


def channel_attention(x, w1, w2):
    """x: (N, C, H, W); w1: (Cr, C); w2: (C, Cr) -> sigmoid attention (N, C, 1, 1)."""
    N, C, H, W = x.shape
    HW = H * W
    Cr = w1.shape[0]
    NC = N * C

    x_rows = x.reshape(NC, HW)                 # rows on sublanes, HW on lanes
    itemsize = x_rows.dtype.itemsize
    target_block_bytes, vmem_limit = _vmem_budget()

    # ---- joint (rows_tile, hw_tile) sizing against the VMEM budget ----------
    rows_min = NC if NC < 8 else 8
    hw_budget_elems = max(128, target_block_bytes // (rows_min * itemsize))
    if HW <= hw_budget_elems:
        hw_tile = HW                           # full spatial extent per block
    else:
        # Tile HW as a multiple of 128; the budget guarantees >= 512 lanes so
        # each strided DMA run stays >= 2 KiB.
        hw_tile = (hw_budget_elems // 128) * 128
    mask_needed = (HW % hw_tile) != 0

    if NC <= 8:
        rows_tile = NC                         # full-dim row block
    else:
        rows_budget = max(8, (target_block_bytes // (hw_tile * itemsize)) // 8 * 8)
        # Cap at ~NC/2 rows so grid[0] >= 2 and both v7x TensorCores get work.
        half_rows = max(8, (((NC + 1) // 2) + 7) // 8 * 8)
        rows_tile = min(rows_budget, ((NC + 7) // 8) * 8, half_rows)

    grid = (pl.cdiv(NC, rows_tile), pl.cdiv(HW, hw_tile))

    # Deeper input pipeline when the HW (reduction) axis actually iterates.
    if grid[1] > 1:
        try:
            x_spec = pl.BlockSpec((rows_tile, hw_tile), lambda r, s: (r, s),
                                  pipeline_mode=pl.Buffered(3))
        except (TypeError, AttributeError):
            x_spec = pl.BlockSpec((rows_tile, hw_tile), lambda r, s: (r, s))
    else:
        x_spec = pl.BlockSpec((rows_tile, hw_tile), lambda r, s: (r, s))

    pool_kernel = functools.partial(
        _pool_kernel, hw=HW, hw_tile=hw_tile, mask_needed=mask_needed)

    # NOTE: if NC % rows_tile != 0 the last row-block also reduces padded rows;
    # those rows are independent and dropped on output writeback (wasted work
    # only, never affects valid rows).
    sum_out, max_out = pl.pallas_call(
        pool_kernel,
        out_shape=(jax.ShapeDtypeStruct((NC, 1), jnp.float32),
                   jax.ShapeDtypeStruct((NC, 1), jnp.float32)),
        grid_spec=pltpu.PrefetchScalarGridSpec(
            num_scalar_prefetch=0,
            grid=grid,
            in_specs=[x_spec],
            out_specs=[pl.BlockSpec((rows_tile, 1), lambda r, s: (r, 0)),
                       pl.BlockSpec((rows_tile, 1), lambda r, s: (r, 0))],
        ),
        compiler_params=pltpu.CompilerParams(
            dimension_semantics=("parallel", "arbitrary"),
            vmem_limit_bytes=vmem_limit,
        ),
    )(x_rows)

    pooled_sum = sum_out.reshape(N, C)
    pooled_max = max_out.reshape(N, C)
    w1t = jnp.transpose(w1)                    # (C, Cr)
    w2t = jnp.transpose(w2)                    # (Cr, C)

    nb = N if N <= 256 else 256
    att = pl.pallas_call(
        functools.partial(_mlp_kernel, inv_hw=1.0 / HW),
        out_shape=jax.ShapeDtypeStruct((N, C), jnp.float32),
        grid_spec=pltpu.PrefetchScalarGridSpec(
            num_scalar_prefetch=0,
            grid=(pl.cdiv(N, nb),),
            in_specs=[
                pl.BlockSpec((nb, C), lambda n: (n, 0)),
                pl.BlockSpec((nb, C), lambda n: (n, 0)),
                pl.BlockSpec((C, Cr), lambda n: (0, 0)),
                pl.BlockSpec((Cr, C), lambda n: (0, 0)),
            ],
            out_specs=pl.BlockSpec((nb, C), lambda n: (n, 0)),
        ),
        compiler_params=pltpu.CompilerParams(
            dimension_semantics=("parallel",),
        ),
    )(pooled_sum, pooled_max, w1t, w2t)

    return att.reshape(N, C, 1, 1)


def channel_attention_ref(x, w1, w2):
    """Pure-JAX reference mirroring the PyTorch forward."""
    avg = jnp.mean(x, axis=(2, 3))             # (N, C)
    mx = jnp.max(x, axis=(2, 3))               # (N, C)

    def mlp(v):                                # v: (N, C)
        h = jnp.maximum(v @ w1.T, 0.0)         # (N, Cr)
        return h @ w2.T                        # (N, C)

    att = jax.nn.sigmoid(mlp(avg) + mlp(mx))   # (N, C)
    return att[:, :, None, None]


if __name__ == "__main__":
    # Small, module-consistent shapes: batch=2, channels=4, spatial=16x16.
    N, C, H, W = 2, 4, 16, 16
    reduction_ratio = 16
    Cr = max(1, C // reduction_ratio)

    key = jax.random.PRNGKey(0)
    kx, k1, k2 = jax.random.split(key, 3)
    x = jax.random.normal(kx, (N, C, H, W), dtype=jnp.float32)
    # Conv2d(C, Cr, 1, bias=False) weight is (Cr, C, 1, 1) -> use (Cr, C).
    w1 = 0.1 * jax.random.normal(k1, (Cr, C), dtype=jnp.float32)
    # Conv2d(Cr, C, 1, bias=False) weight is (C, Cr, 1, 1) -> use (C, Cr).
    w2 = 0.1 * jax.random.normal(k2, (C, Cr), dtype=jnp.float32)

    out = jax.block_until_ready(channel_attention(x, w1, w2))

    ref = channel_attention_ref(x, w1, w2)
    assert out.shape == (N, C, 1, 1)
    assert jnp.allclose(out, ref, atol=1e-5, rtol=1e-5)

    print("KERNEL_OK")
</pallas_src>

<mosaic_0001>
module attributes {stable_mosaic.version = 11 : i64} {
  func.func @_pool_kernel(%arg0: i32, %arg1: i32, %arg2: memref<8x256xf32, #tpu.memory_space<vmem>>, %arg3: memref<8x1xf32, #tpu.memory_space<vmem>>, %arg4: memref<8x1xf32, #tpu.memory_space<vmem>>) attributes {dimension_semantics = [#tpu.dimension_semantics<parallel>, #tpu.dimension_semantics<arbitrary>], iteration_bounds = array<i64: 1, 1>, scalar_prefetch = 0 : i64, scratch_operands = 0 : i64, tpu.core_type = #tpu.core_type<tc>, window_params = [{transform_indices = @transform_0, window_bounds = array<i64: 8, 256>}, {transform_indices = @transform_1, window_bounds = array<i64: 8, 1>}, {transform_indices = @transform_2, window_bounds = array<i64: 8, 1>}]} {
    %c0_i32 = arith.constant 0 : i32
    %0 = arith.cmpi eq, %arg1, %c0_i32 : i32
    %1 = arith.extui %0 : i1 to i32
    %c0_i32_0 = arith.constant 0 : i32
    %2 = arith.cmpi ne, %1, %c0_i32_0 : i32
    scf.if %2 {
      %cst_11 = arith.constant 0.000000e+00 : f32
      %14 = vector.broadcast %cst_11 : f32 to vector<8x1xf32>
      %c0_12 = arith.constant 0 : index
      %c0_13 = arith.constant 0 : index
      %15 = vector.load %arg3[%c0_12, %c0_13] : memref<8x1xf32, #tpu.memory_space<vmem>>, vector<8x1xf32>
      tpu.vector_store %arg3[%c0_12, %c0_13], %14 {strides = array<i32>} : memref<8x1xf32, #tpu.memory_space<vmem>>, vector<8x1xf32>,
      %cst_14 = arith.constant 0xFF800000 : f32
      %16 = vector.broadcast %cst_14 : f32 to vector<8x1xf32>
      %c0_15 = arith.constant 0 : index
      %c0_16 = arith.constant 0 : index
      %17 = vector.load %arg4[%c0_15, %c0_16] : memref<8x1xf32, #tpu.memory_space<vmem>>, vector<8x1xf32>
      tpu.vector_store %arg4[%c0_15, %c0_16], %16 {strides = array<i32>} : memref<8x1xf32, #tpu.memory_space<vmem>>, vector<8x1xf32>,
    } else {
    }
    %c0 = arith.constant 0 : index
    %c0_1 = arith.constant 0 : index
    %3 = vector.load %arg2[%c0, %c0_1] : memref<8x256xf32, #tpu.memory_space<vmem>>, vector<8x256xf32>
    %c0_2 = arith.constant 0 : index
    %c0_3 = arith.constant 0 : index
    %4 = vector.load %arg3[%c0_2, %c0_3] : memref<8x1xf32, #tpu.memory_space<vmem>>, vector<8x1xf32>
    %cst = arith.constant dense<0.000000e+00> : vector<8xf32>
    %5 = vector.multi_reduction <add>, %3, %cst [1] : vector<8x256xf32> to vector<8xf32>
    %6 = vector.shape_cast %5 : vector<8xf32> to vector<8x1xf32>
    %7 = arith.addf %4, %6 : vector<8x1xf32>
    %c0_4 = arith.constant 0 : index
    %c0_5 = arith.constant 0 : index
    %8 = vector.load %arg3[%c0_4, %c0_5] : memref<8x1xf32, #tpu.memory_space<vmem>>, vector<8x1xf32>
    tpu.vector_store %arg3[%c0_4, %c0_5], %7 {strides = array<i32>} : memref<8x1xf32, #tpu.memory_space<vmem>>, vector<8x1xf32>,
    %c0_6 = arith.constant 0 : index
    %c0_7 = arith.constant 0 : index
    %9 = vector.load %arg4[%c0_6, %c0_7] : memref<8x1xf32, #tpu.memory_space<vmem>>, vector<8x1xf32>
    %cst_8 = arith.constant dense<0xFF800000> : vector<8xf32>
    %10 = vector.multi_reduction <maximumf>, %3, %cst_8 [1] : vector<8x256xf32> to vector<8xf32>
    %11 = vector.shape_cast %10 : vector<8xf32> to vector<8x1xf32>
    %12 = arith.maximumf %9, %11 : vector<8x1xf32>
    %c0_9 = arith.constant 0 : index
    %c0_10 = arith.constant 0 : index
    %13 = vector.load %arg4[%c0_9, %c0_10] : memref<8x1xf32, #tpu.memory_space<vmem>>, vector<8x1xf32>
    tpu.vector_store %arg4[%c0_9, %c0_10], %12 {strides = array<i32>} : memref<8x1xf32, #tpu.memory_space<vmem>>, vector<8x1xf32>,
    return
  }
  func.func @transform_0(%arg0: i32, %arg1: i32) -> (i32, i32) {
    %c0_i32 = arith.constant 0 : i32
    return %arg0, %arg1 : i32, i32
  }
  func.func @transform_1(%arg0: i32, %arg1: i32) -> (i32, i32) {
    %c0_i32 = arith.constant 0 : i32
    %c0_i32_0 = arith.constant 0 : i32
    return %arg0, %c0_i32 : i32, i32
  }
  func.func @transform_2(%arg0: i32, %arg1: i32) -> (i32, i32) {
    %c0_i32 = arith.constant 0 : i32
    %c0_i32_0 = arith.constant 0 : i32
    return %arg0, %c0_i32 : i32, i32
  }
}

</mosaic_0001>

<bundles_post_ra>
// kernel: tpu_custom_call.1
= control target key start
LH: loop header
LB: loop body
LE: loop exit
PB: predicated region body
PF: predicated region fallthrough
CT: control target
= control target key end

     0   :  { %8 = vsyncpa [#allocation3], 0  ;;  %s80_s9 = smov [#allocation2]   ;;  %s132_s0 = inlined_call_operand.hbm [shape: f32[8,256], index: 0, kind: input, shape index: {}]   ;;  %s133_s1 = inlined_call_operand.vmem [shape: f32[8,1], index: 1, kind: output, shape index: {0}]   ;;  %s134_s2 = inlined_call_operand.vmem [shape: f32[8,1], index: 2, kind: output, shape index: {1}]  }
   0x1   :  { %s15_s10 = sshll.u32 %s80_s9, 4  ;;  %s56_s13 = scalar_lea.hbm %s132_s0, 256  ;;  %s16_s10 = int_to_ptr.vmem [resolvable:$true] %s15_s10 }
   0x2   :  { %p57_p0 = scmp.ne.s32.totalorder %s132_s0, %s56_s13  ;;  %p60_p1 = scmp.lt.u32.totalorder %s56_s13, %s132_s0 }
   0x4   :  { %p62_p2 = pnand %p60_p1, %p57_p0 }
   0x6   :  { %65 = shalt.err (!%p62_p2)
}
   0x7   :  { %s66_s18 = scalar_lea.vmem %s16_s10, 256  ;;  %p71_p4 = scmp.lt.s32.totalorder %s16_s10, %s16_s10 }
   0x8   :  { %p67_p3 = scmp.ne.s32.totalorder %s16_s10, %s66_s18  ;;  %p72_p5 = scmp.lt.s32.totalorder %s66_s18, %s66_s18 }
   0xa   :  { %p73_p6 = por %p72_p5, %p71_p4 }
   0xc   :  { %p74_p7 = pnand %p73_p6, %p67_p3 }
   0xe   :  { %77 = shalt.err (!%p74_p7)
}
   0xf   :  { %18 = dma.hbm_to_vmem [thread:$0]  %s132_s0, 256, %s16_s10, [#allocation3]  }
  0x10   :  { %78 = dma.done.wait [#allocation3], 256  }
  0x11   :  { %79 = vsyncadd [#allocation3], 4294967040  ;;  %vm26_vm0 = vcmask 7168   ;;  %v81_v0 = vmov 0.0   ;;  %v29_v1 = vld [vmem:[#allocation2] sm:$0xff]  ;;  %v30_v2 = vld [vmem:[#allocation2 + $0x8] sm:$0xff] }
  0x12   :  { %27 = vst.msk [vmem:[%s133_s1] sm:$0xff] %vm26_vm0, %v81_v0  ;;  %v32_v3 = vadd.f32 %v30_v2, %v29_v1  ;;  %v39_v4 = vmax.f32 %v29_v1, %v30_v2  ;;  %v82_v5 = vmov -inf  }
  0x13   :  { %28 = vst.msk [vmem:[%s134_s2] sm:$0xff] %vm26_vm0, %v82_v5 }
  0x14   :  { %33 = vadd.xlane.f32.xlu0 %v32_v3 }
  0x18   :  { %40 = vmax.xlane.f32.xlu0 %v39_v4 }
  0x19   :  { %v31_v6 = vld [vmem:[%s133_s1] sm:$0xff] }
  0x1a   :  { %v38_v9 = vld [vmem:[%s134_s2] sm:$0xff] }
  0xa1   :  { %v34_v7 = vpop.xlane.xlu0 %33 }
  0xa2   :  { %v35_v8 = vadd.f32 %v34_v7, %v31_v6 }
  0xa4   :  { %37 = vst.msk [vmem:[%s133_s1] sm:$0xff] %vm26_vm0, %v35_v8 }
  0xa5   :  { %v41_v10 = vpop.xlane.xlu0 %40 }
  0xa6   :  { %v42_v11 = vmax.f32 %v38_v9, %v41_v10 }
  0xa8   :  { %43 = vst.msk [vmem:[%s134_s2] sm:$0xff] %vm26_vm0, %v42_v11 }
  0xa9   :  { %52 = vsyncpa [#allocation3], 1 }

</bundles_post_ra>
